<compile_context>
chip_gen: v7x
topology: tpu7x:2x2x1
jax: 0.10.0
libtpu: 0.0.40
codegen_flags: <defaults>
</compile_context>

<pallas_src>
import functools

import jax
import jax.numpy as jnp
from jax.experimental import pallas as pl
from jax.experimental.pallas import tpu as pltpu


def _row_losses(x_ref, t_ref, *, eps: float, n_total: int, tn: int):
    """Per-row smoothed cross-entropy for one (TN, C) tile; padded rows -> 0."""
    x = x_ref[...].astype(jnp.float32)          # (TN, C)
    t = t_ref[...]                              # (TN, 1) int32
    tn_rows, c = x.shape
    c_f = float(c)

    # log-softmax pieces: logp = x - (m + lse); never materialize full logp.
    m = jnp.max(x, axis=1, keepdims=True)                       # (TN, 1)
    z = x - m
    lse = jnp.log(jnp.sum(jnp.exp(z), axis=1, keepdims=True))   # (TN, 1)
    mlse = m + lse                                              # (TN, 1)

    # x at the target class via a masked reduce (no one-hot tensor).
    col = jax.lax.broadcasted_iota(jnp.int32, (tn_rows, c), 1)
    x_t = jnp.sum(jnp.where(col == t, x, 0.0), axis=1, keepdims=True)
    sum_x = jnp.sum(x, axis=1, keepdims=True)

    # loss = sum_c(-logp * smoothed_onehot)
    #      = (1-eps) * (mlse - x_t) + (eps/C) * (C*mlse - sum_c x)
    loss = (1.0 - eps) * (mlse - x_t) + (eps / c_f) * (c_f * mlse - sum_x)

    # Zero out rows that are batch padding so reductions stay exact.
    row = (jax.lax.broadcasted_iota(jnp.int32, (tn_rows, 1), 0)
           + pl.program_id(0) * tn)
    return jnp.where(row < n_total, loss, 0.0)


def _per_row_kernel(x_ref, t_ref, loss_ref, *, eps, n_total, tn):
    loss = _row_losses(x_ref, t_ref, eps=eps, n_total=n_total, tn=tn)
    loss_ref[...] = loss.astype(loss_ref.dtype)


def _sum_kernel(x_ref, t_ref, acc_ref, *, eps, n_total, tn):
    @pl.when(pl.program_id(0) == 0)
    def _():
        acc_ref[...] = jnp.zeros_like(acc_ref)
    loss = _row_losses(x_ref, t_ref, eps=eps, n_total=n_total, tn=tn)
    acc_ref[...] += jnp.sum(loss, axis=0, keepdims=True)   # (1, 1)


def _choose_block_rows(n_pad8: int, c: int) -> int:
    # Size off the lane-padded f32 footprint of one x tile (~2 MiB), so the
    # double-buffered input + f32 temporaries sit well under 32 MiB VMEM.
    c_pad = ((c + 127) // 128) * 128
    budget_bytes = 2 * 1024 * 1024
    tn = budget_bytes // (c_pad * 4)
    tn = max(8, min(tn, 4096, n_pad8))
    return max(8, (tn // 8) * 8)


def label_smoothing_regression(x, target, *, eps: float = 0.01,
                               reduction: str = "mean", block_rows=None):
    """JAX/Pallas equivalent of LabelSmoothingRegression.forward.

    x: (N, C) logits (f32 or bf16 -- cast to f32 happens in-kernel);
    target: (N,) int class indices.
    Returns scalar for 'mean'/'sum', (N,) vector for 'none'.
    """
    if reduction not in ("none", "mean", "sum"):
        raise ValueError(f"Unknown reduction {reduction}")
    if x.ndim != 2:
        raise ValueError(f"Only 2 dimension tensor are implemented, got {x.shape}")
    if x.shape[0] != target.shape[0]:
        raise ValueError("Batch size mismatch between x and target")

    n, c = x.shape
    n_pad8 = ((n + 7) // 8) * 8
    if block_rows is None:
        tn = _choose_block_rows(n_pad8, c)
    else:
        tn = max(8, (min(int(block_rows), n_pad8) // 8) * 8)
    n_pad = ((n_pad8 + tn - 1) // tn) * tn
    num_blocks = n_pad // tn

    x_p = x if n_pad == n else jnp.pad(x, ((0, n_pad - n), (0, 0)))
    t2d = target.astype(jnp.int32).reshape(n, 1)
    t_p = t2d if n_pad == n else jnp.pad(t2d, ((0, n_pad - n), (0, 0)))

    in_specs = [
        pl.BlockSpec((tn, c), lambda i: (i, 0)),   # x tile
        pl.BlockSpec((tn, 1), lambda i: (i, 0)),   # target column tile
    ]

    if reduction == "none":
        kernel = functools.partial(_per_row_kernel, eps=float(eps),
                                   n_total=n, tn=tn)
        per_row = pl.pallas_call(
            kernel,
            out_shape=jax.ShapeDtypeStruct((n_pad, 1), jnp.float32),
            grid=(num_blocks,),
            in_specs=in_specs,
            out_specs=pl.BlockSpec((tn, 1), lambda i: (i, 0)),
            compiler_params=pltpu.CompilerParams(
                dimension_semantics=("parallel",),
                vmem_limit_bytes=32 * 1024 * 1024,
            ),
        )(x_p, t_p)
        return per_row[:n, 0]

    # 'mean' / 'sum': finish the reduction in-kernel with a resident (1,1)
    # f32 accumulator (grid axis is a reduction -> 'arbitrary').
    kernel = functools.partial(_sum_kernel, eps=float(eps), n_total=n, tn=tn)
    total = pl.pallas_call(
        kernel,
        out_shape=jax.ShapeDtypeStruct((1, 1), jnp.float32),
        grid=(num_blocks,),
        in_specs=in_specs,
        out_specs=pl.BlockSpec((1, 1), lambda i: (0, 0)),
        compiler_params=pltpu.CompilerParams(
            dimension_semantics=("arbitrary",),
            vmem_limit_bytes=32 * 1024 * 1024,
        ),
    )(x_p, t_p)[0, 0]

    if reduction == "sum":
        return total
    return total / n                  # mean over the *real* batch size


def _reference(x, target, eps=0.01, reduction="mean"):
    n, c = x.shape
    logp = jax.nn.log_softmax(x.astype(jnp.float32), axis=1)
    one_hot = jnp.zeros((n, c), jnp.float32).at[jnp.arange(n), target].set(1.0 - eps)
    one_hot = one_hot + eps / c
    loss = jnp.sum(-logp * one_hot, axis=1)
    if reduction == "mean":
        return jnp.mean(loss)
    if reduction == "sum":
        return jnp.sum(loss)
    return loss


if __name__ == "__main__":
    key = jax.random.PRNGKey(0)
    ok = True

    # Case 1: tiny aligned batch, single block.
    k1, k2, k3, k4, k5, k6 = jax.random.split(key, 6)
    N1, C1 = 8, 32
    x1 = jax.random.normal(k1, (N1, C1), dtype=jnp.float32)
    t1 = jax.random.randint(k2, (N1,), 0, C1, dtype=jnp.int32)
    for red in ("mean", "sum", "none"):
        got = jax.block_until_ready(
            label_smoothing_regression(x1, t1, eps=0.01, reduction=red))
        ref = _reference(x1, t1, eps=0.01, reduction=red)
        ok = ok and bool(jnp.allclose(got, ref, atol=1e-5, rtol=1e-5))

    # Case 2: ragged batch + forced small tile -> multi-block grid + padding.
    N2, C2 = 20, 32
    x2 = jax.random.normal(k3, (N2, C2), dtype=jnp.float32)
    t2 = jax.random.randint(k4, (N2,), 0, C2, dtype=jnp.int32)
    for red in ("mean", "sum", "none"):
        got = jax.block_until_ready(
            label_smoothing_regression(x2, t2, eps=0.01, reduction=red,
                                       block_rows=8))
        ref = _reference(x2, t2, eps=0.01, reduction=red)
        ok = ok and bool(jnp.allclose(got, ref, atol=1e-5, rtol=1e-5))

    # Case 3: bf16 logits, non-power-of-two class count.
    N3, C3 = 24, 48
    x3 = jax.random.normal(k5, (N3, C3), dtype=jnp.float32).astype(jnp.bfloat16)
    t3 = jax.random.randint(k6, (N3,), 0, C3, dtype=jnp.int32)
    got = jax.block_until_ready(
        label_smoothing_regression(x3, t3, eps=0.05, reduction="mean"))
    ref = _reference(x3, t3, eps=0.05, reduction="mean")
    ok = ok and bool(jnp.allclose(got, ref, atol=1e-4, rtol=1e-4))

    print("KERNEL_OK" if ok else "KERNEL_MISMATCH")
</pallas_src>

<mosaic_0001>
module attributes {stable_mosaic.version = 11 : i64} {
  func.func @_sum_kernel(%arg0: i32, %arg1: memref<8x32xf32, #tpu.memory_space<vmem>>, %arg2: memref<8x1xi32, #tpu.memory_space<vmem>>, %arg3: memref<1x1xf32, #tpu.memory_space<vmem>>) attributes {dimension_semantics = [#tpu.dimension_semantics<arbitrary>], iteration_bounds = array<i64: 1>, scalar_prefetch = 0 : i64, scratch_operands = 0 : i64, tpu.core_type = #tpu.core_type<tc>, window_params = [{transform_indices = @transform_0, window_bounds = array<i64: 8, 32>}, {transform_indices = @transform_1, window_bounds = array<i64: 8, 1>}, {pipeline_mode = #tpu.pipeline_mode<synchronous>, transform_indices = @transform_2, window_bounds = array<i64: 1, 1>}]} {
    %c0_i32 = arith.constant 0 : i32
    %0 = arith.cmpi eq, %arg0, %c0_i32 : i32
    %1 = arith.extui %0 : i1 to i32
    %c0_i32_0 = arith.constant 0 : i32
    %2 = arith.cmpi ne, %1, %c0_i32_0 : i32
    scf.if %2 {
      %cst_18 = arith.constant 0.000000e+00 : f32
      %45 = vector.broadcast %cst_18 : f32 to vector<1x1xf32>
      %c0_19 = arith.constant 0 : index
      %c0_20 = arith.constant 0 : index
      %46 = vector.load %arg3[%c0_19, %c0_20] : memref<1x1xf32, #tpu.memory_space<vmem>>, vector<1x1xf32>
      tpu.vector_store %arg3[%c0_19, %c0_20], %45 {strides = array<i32>} : memref<1x1xf32, #tpu.memory_space<vmem>>, vector<1x1xf32>,
    } else {
    }
    %c0 = arith.constant 0 : index
    %c0_1 = arith.constant 0 : index
    %3 = vector.load %arg1[%c0, %c0_1] : memref<8x32xf32, #tpu.memory_space<vmem>>, vector<8x32xf32>
    %c0_2 = arith.constant 0 : index
    %c0_3 = arith.constant 0 : index
    %4 = vector.load %arg2[%c0_2, %c0_3] : memref<8x1xi32, #tpu.memory_space<vmem>>, vector<8x1xi32>
    %cst = arith.constant dense<0xFF800000> : vector<8xf32>
    %5 = vector.multi_reduction <maximumf>, %3, %cst [1] : vector<8x32xf32> to vector<8xf32>
    %6 = vector.shape_cast %5 : vector<8xf32> to vector<8x1xf32>
    %7 = vector.broadcast %6 : vector<8x1xf32> to vector<8x32xf32>
    %8 = arith.subf %3, %7 : vector<8x32xf32>
    %9 = math.exp %8 : vector<8x32xf32>
    %cst_4 = arith.constant dense<0.000000e+00> : vector<8xf32>
    %10 = vector.multi_reduction <add>, %9, %cst_4 [1] : vector<8x32xf32> to vector<8xf32>
    %11 = vector.shape_cast %10 : vector<8xf32> to vector<8x1xf32>
    %12 = math.log %11 : vector<8x1xf32>
    %13 = arith.addf %6, %12 : vector<8x1xf32>
    %14 = tpu.iota {dimensions = array<i32: 1>} : vector<8x32xi32>
    %15 = vector.broadcast %4 : vector<8x1xi32> to vector<8x32xi32>
    %16 = arith.cmpi eq, %14, %15 : vector<8x32xi32>
    %cst_5 = arith.constant 0.000000e+00 : f32
    %17 = vector.broadcast %cst_5 : f32 to vector<8x32xf32>
    %18 = arith.select %16, %3, %17 : vector<8x32xi1>, vector<8x32xf32>
    %cst_6 = arith.constant dense<0.000000e+00> : vector<8xf32>
    %19 = vector.multi_reduction <add>, %18, %cst_6 [1] : vector<8x32xf32> to vector<8xf32>
    %20 = vector.shape_cast %19 : vector<8xf32> to vector<8x1xf32>
    %cst_7 = arith.constant dense<0.000000e+00> : vector<8xf32>
    %21 = vector.multi_reduction <add>, %3, %cst_7 [1] : vector<8x32xf32> to vector<8xf32>
    %22 = vector.shape_cast %21 : vector<8xf32> to vector<8x1xf32>
    %23 = arith.subf %13, %20 : vector<8x1xf32>
    %cst_8 = arith.constant 9.900000e-01 : f32
    %24 = vector.broadcast %cst_8 : f32 to vector<8x1xf32>
    %25 = arith.mulf %24, %23 : vector<8x1xf32>
    %cst_9 = arith.constant 3.200000e+01 : f32
    %26 = vector.broadcast %cst_9 : f32 to vector<8x1xf32>
    %27 = arith.mulf %26, %13 : vector<8x1xf32>
    %28 = arith.subf %27, %22 : vector<8x1xf32>
    %cst_10 = arith.constant 3.125000e-04 : f32
    %29 = vector.broadcast %cst_10 : f32 to vector<8x1xf32>
    %30 = arith.mulf %29, %28 : vector<8x1xf32>
    %31 = arith.addf %25, %30 : vector<8x1xf32>
    %32 = tpu.iota {dimensions = array<i32: 0>} : vector<8x1xi32>
    %c8_i32 = arith.constant 8 : i32
    %33 = arith.muli %arg0, %c8_i32 : i32
    %34 = vector.broadcast %33 : i32 to vector<8x1xi32>
    %35 = arith.addi %32, %34 : vector<8x1xi32>
    %c8_i32_11 = arith.constant 8 : i32
    %36 = vector.broadcast %c8_i32_11 : i32 to vector<8x1xi32>
    %37 = arith.cmpi slt, %35, %36 : vector<8x1xi32>
    %cst_12 = arith.constant 0.000000e+00 : f32
    %38 = vector.broadcast %cst_12 : f32 to vector<8x1xf32>
    %39 = arith.select %37, %31, %38 : vector<8x1xi1>, vector<8x1xf32>
    %c0_13 = arith.constant 0 : index
    %c0_14 = arith.constant 0 : index
    %40 = vector.load %arg3[%c0_13, %c0_14] : memref<1x1xf32, #tpu.memory_space<vmem>>, vector<1x1xf32>
    %cst_15 = arith.constant dense<0.000000e+00> : vector<1xf32>
    %41 = vector.multi_reduction <add>, %39, %cst_15 [0] : vector<8x1xf32> to vector<1xf32>
    %42 = vector.shape_cast %41 : vector<1xf32> to vector<1x1xf32>
    %43 = arith.addf %40, %42 : vector<1x1xf32>
    %c0_16 = arith.constant 0 : index
    %c0_17 = arith.constant 0 : index
    %44 = vector.load %arg3[%c0_16, %c0_17] : memref<1x1xf32, #tpu.memory_space<vmem>>, vector<1x1xf32>
    tpu.vector_store %arg3[%c0_16, %c0_17], %43 {strides = array<i32>} : memref<1x1xf32, #tpu.memory_space<vmem>>, vector<1x1xf32>,
    return
  }
  func.func @transform_0(%arg0: i32) -> (i32, i32) {
    %c0_i32 = arith.constant 0 : i32
    %c0_i32_0 = arith.constant 0 : i32
    return %arg0, %c0_i32 : i32, i32
  }
  func.func @transform_1(%arg0: i32) -> (i32, i32) {
    %c0_i32 = arith.constant 0 : i32
    %c0_i32_0 = arith.constant 0 : i32
    return %arg0, %c0_i32 : i32, i32
  }
  func.func @transform_2(%arg0: i32) -> (i32, i32) {
    %c0_i32 = arith.constant 0 : i32
    %c0_i32_0 = arith.constant 0 : i32
    %c0_i32_1 = arith.constant 0 : i32
    return %c0_i32, %c0_i32_0 : i32, i32
  }
}

</mosaic_0001>

<bundles_post_ra>
// kernel: tpu_custom_call.1
= control target key start
LH: loop header
LB: loop body
LE: loop exit
PB: predicated region body
PF: predicated region fallthrough
CT: control target
= control target key end

     0   :  { %vm20_vm0 = vcmask 261120   ;;  %s157_s0 = inlined_call_operand.vmem [shape: f32[8,32], index: 0, kind: input, shape index: {}]   ;;  %s158_s1 = inlined_call_operand.vmem [shape: s32[8,1], index: 1, kind: input, shape index: {}]   ;;  %s159_s2 = inlined_call_operand.hbm [shape: f32[1,1], index: 2, kind: output, shape index: {}]  }
   0x1   :  { %v18_v0 = vld [vmem:[%s157_s0] sm:$0xff] }
   0x2   :  { %7 = vsyncpa [#allocation3], 0  ;;  %v21_v1 = vsel %vm20_vm0, %v18_v0, -inf  ;;  %v115_v2 = vmov 0   ;;  %v19_v3 = vld [vmem:[%s158_s1] sm:$0xff]  ;;  %v33_v7 = vlaneseq  ;;  %v43_v14 = vsel %vm20_vm0, %v18_v0, 0.0 }
   0x3   :  { %86 = vset.pattern.permute.xlu0 %v115_v2  ;;  %vm16_vm2 = vcmask 0   ;;  %v116_v15 = vmov 0.0   ;;  %s117_s0 = smov [#allocation2]  }
   0x4   :  { %22 = vmax.xlane.f32.xlu0 %v21_v1  ;;  %v34_v8 = vand.u32 127, %v33_v7  ;;  %17 = vst.msk [vmem:[#allocation2] sm:$0x1] %vm16_vm2, %v116_v15  ;;  %s75_s1 = sshll.u32 %s117_s0, 4  ;;  %s76_s1 = int_to_ptr.vmem [resolvable:$true] %s75_s1 }
   0x5   :  { %s91_s13 = scalar_lea.vmem %s76_s1, 16  ;;  %s95_s14 = scalar_lea.vmem %s76_s1, 32 }
   0x6   :  { %p92_p0 = scmp.ne.s32.totalorder %s76_s1, %s91_s13  ;;  %p96_p1 = scmp.lt.s32.totalorder %s76_s1, %s76_s1 }
   0x7   :  { %p97_p2 = scmp.lt.s32.totalorder %s95_s14, %s91_s13 }
   0x9   :  { %p98_p3 = por %p97_p2, %p96_p1 }
   0xb   :  { %v59_v33 = vld [vmem:[#allocation2] sm:$0x1]  ;;  %p99_p4 = pnand %p98_p3, %p92_p0 }
  0x1a   :  { %36 = vperm.xlu0 %86, %v19_v3  }
  0x91   :  { %v23_v4 = vpop.xlane.xlu0 %22 }
  0x92   :  { %v24_v5 = vsub.f32 %v18_v0, %v23_v4 }
  0x94   :  { %v25_v6 = vmul.f32 1.442695, %v24_v5 }
  0x96   :  { %87 = vpow2.f32 %v25_v6 }
  0x99   :  { %v37_v9 = vpop.permute.xlu0 %36 }
  0x9a   :  { %vm38_vm1 = vcmp.eq.s32.totalorder %v34_v8, %v37_v9 }
  0x9b   :  { %v39_v11 = vsel %vm38_vm1, %v18_v0, 0.0 }
  0x9c   :  { %v40_v13 = vsel %vm20_vm0, %v39_v11, 0.0 }
  0xa0   :  { %v88_v10 = vpop.eup %87 }
  0xa1   :  { %v27_v12 = vsel %vm20_vm0, %v88_v10, 0.0 }
  0xa2   :  { %28 = vadd.xlane.f32.xlu1 %v27_v12 }
  0xa6   :  { %41 = vadd.xlane.f32.xlu1 %v40_v13 }
  0xaa   :  { %44 = vadd.xlane.f32.xlu1 %v43_v14 }
 0x12f   :  { %v29_v16 = vpop.xlane.xlu1 %28 }
 0x130   :  { %89 = vlog2.f32 %v29_v16 }
 0x133   :  { %v42_v17 = vpop.xlane.xlu1 %41 }
 0x137   :  { %v45_v21 = vpop.xlane.xlu1 %44 }
 0x13a   :  { %v90_v18 = vpop.eup %89 }
 0x13b   :  { %v31_v19 = vmul.f32 0.6931472, %v90_v18 }
 0x13d   :  { %v32_v20 = vadd.f32 %v31_v19, %v23_v4 }
 0x13f   :  { %v46_v22 = vsub.f32 %v32_v20, %v42_v17  ;;  %v48_v23 = vmul.f32 32.0, %v32_v20 }
 0x141   :  { %v49_v24 = vsub.f32 %v48_v23, %v45_v21  ;;  %v47_v25 = vmul.f32 0.99, %v46_v22 }
 0x143   :  { %v50_v26 = vmul.f32 0.0003125, %v49_v24 }
 0x145   :  { %v51_v27 = vadd.f32 %v50_v26, %v47_v25 }
 0x147   :  { %v60_v28 = vrot.slane %v51_v27, 4 }
 0x149   :  { %v61_v29 = vadd.f32 %v60_v28, %v51_v27 }
 0x14b   :  { %v62_v30 = vrot.slane %v61_v29, 2 }
 0x14d   :  { %v63_v31 = vadd.f32 %v62_v30, %v61_v29 }
 0x14f   :  { %v64_v32 = vrot.slane %v63_v31, 1 }
 0x151   :  { %v65_v34 = vadd.f32 %v64_v32, %v63_v31 }
 0x153   :  { %v66_v35 = vadd.f32 %v65_v34, %v59_v33 }
 0x155   :  { %68 = vst.msk [vmem:[#allocation2] sm:$0x1] %vm16_vm2, %v66_v35 }
 0x156   :  { %102 = shalt.err (!%p99_p4)
}
 0x157   :  { %s103_s17 = scalar_lea.hbm %s159_s2, 16 }
 0x158   :  { %p104_p5 = scmp.ne.s32.totalorder %s159_s2, %s103_s17  ;;  %p107_p6 = scmp.lt.u32.totalorder %s103_s17, %s159_s2 }
 0x15a   :  { %p109_p7 = pnand %p107_p6, %p104_p5 }
 0x15c   :  { %112 = shalt.err (!%p109_p7)
}
 0x15d   :  { %78 = dma.vmem_to_hbm [thread:$0]  %s76_s1, 16, %s159_s2, [#allocation3]  }
 0x15e   :  { %113 = dma.done.wait [#allocation3], 16  }
 0x15f   :  { %114 = vsyncadd [#allocation3], 4294967280 }
 0x160   :  { %82 = vsyncpa [#allocation3], 1 }

</bundles_post_ra>
